<compile_context>
chip_gen: v7x
topology: tpu7x:2x2x1
jax: 0.10.0
libtpu: 0.0.40
codegen_flags: <defaults>
</compile_context>

<pallas_src>
import functools

import jax
import jax.numpy as jnp
from jax import lax
from jax.experimental import pallas as pl
from jax.experimental.pallas import tpu as pltpu


def _round_up(x: int, m: int) -> int:
    return ((x + m - 1) // m) * m


def _pick_tile(dim: int, align: int, cap: int, min_tile: int) -> int:
    """Tile size (multiple of `align`, <= cap) that minimizes padding of `dim`.

    If the aligned extent already fits under the cap, take the whole dim in one
    tile (zero padding beyond alignment).  Otherwise search multiples of `align`
    in [min_tile, cap] for the smallest padded extent (ties -> larger tile, for
    fewer grid steps / better MXU utilization).
    """
    aligned = _round_up(dim, align)
    if aligned <= cap:
        return aligned
    best_t, best_pad = None, None
    t = max(min_tile, align)
    while t <= cap:
        padded = _round_up(dim, t)
        if best_pad is None or padded < best_pad or (padded == best_pad and t > best_t):
            best_t, best_pad = t, padded
        t += align
    return best_t


# Contract x (tm, tk) against w (tn, tk) on the shared C axis -> (tm, tn).
_CONTRACT_ON_C = (((1,), (1,)), ((), ()))


def _dot_xc_wc(x_ref, w_ref):
    return lax.dot_general(
        x_ref[...], w_ref[...],
        dimension_numbers=_CONTRACT_ON_C,
        preferred_element_type=jnp.float32,
    )


# ----- Single K step (C fits in one tile): no predication, direct write. -----
def _kernel_single_bias(x_ref, w_ref, b_ref, o_ref):
    o_ref[...] = (_dot_xc_wc(x_ref, w_ref) + b_ref[...]).astype(o_ref.dtype)


def _kernel_single_nobias(x_ref, w_ref, o_ref):
    o_ref[...] = _dot_xc_wc(x_ref, w_ref).astype(o_ref.dtype)


# ----- Multi K step: accumulate directly into the resident f32 output tile. --
def _kernel_multi_bias(x_ref, w_ref, b_ref, o_ref):
    k = pl.program_id(2)

    @pl.when(k == 0)
    def _():
        o_ref[...] = jnp.zeros_like(o_ref)

    o_ref[...] += _dot_xc_wc(x_ref, w_ref)

    @pl.when(k == pl.num_programs(2) - 1)
    def _():
        o_ref[...] += b_ref[...]


def _kernel_multi_nobias(x_ref, w_ref, o_ref):
    k = pl.program_id(2)

    @pl.when(k == 0)
    def _():
        o_ref[...] = jnp.zeros_like(o_ref)

    o_ref[...] += _dot_xc_wc(x_ref, w_ref)


@functools.partial(jax.jit, static_argnames=("use_bias", "cast_inputs_to_bf16"))
def meta_linear_forward(x, weights, bias=None, *, use_bias=True,
                        cast_inputs_to_bf16=False):
    """Pallas implementation of MetaLinearLayer.forward (F.linear semantics).

    x:       [B, C] float32
    weights: [F, C] float32 (PyTorch Linear convention)
    bias:    [F]    float32 (required iff use_bias)
    returns: [B, F] float32

    cast_inputs_to_bf16: opt-in throughput lever for v6e/v7x (bf16 MXU inputs,
    f32 accumulation).  Off by default to preserve full-f32 meta-learning math.
    """
    B, C = x.shape
    F_out, C_w = weights.shape
    if C != C_w:
        raise ValueError(f"Incompatible shapes: x={x.shape}, weights={weights.shape}")
    if use_bias and bias is None:
        raise ValueError("use_bias=True but bias is None")

    # --- Tile selection: bound padding waste, lane-dense N/K, VMEM-safe caps. ---
    tm = _pick_tile(B, 8, 512, 128)        # sublane-aligned rows
    tn = _pick_tile(F_out, 128, 512, 128)  # lane-dense output
    tk = _pick_tile(C, 128, 1024, 128)     # lane-dense contraction

    Bp = _round_up(B, tm)
    Fp = _round_up(F_out, tn)
    Cp = _round_up(C, tk)
    grid_m, grid_n, grid_k = Bp // tm, Fp // tn, Cp // tk

    # Megacore occupancy (v7x has 2 TensorCores; only the parallel axes shard).
    # Only bother when the per-block MXU work is non-trivial.
    if grid_m * grid_n == 1 and max(tm, tn) >= 256:
        if tn >= tm and tn % 256 == 0:
            tn //= 2
        elif tm >= 16 and tm % 16 == 0:
            tm //= 2
        elif tn % 256 == 0:
            tn //= 2
        grid_m, grid_n = Bp // tm, Fp // tn

    # Pad only the axes that actually need it (aligned shapes are pad-free).
    x_p = x if (Bp == B and Cp == C) else jnp.pad(x, ((0, Bp - B), (0, Cp - C)))
    w_p = (weights if (Fp == F_out and Cp == C)
           else jnp.pad(weights, ((0, Fp - F_out), (0, Cp - C))))
    if cast_inputs_to_bf16:
        x_p = x_p.astype(jnp.bfloat16)
        w_p = w_p.astype(jnp.bfloat16)

    out_shape = jax.ShapeDtypeStruct((Bp, Fp), jnp.float32)
    compiler_params = pltpu.CompilerParams(
        dimension_semantics=(("parallel", "parallel") if grid_k == 1
                             else ("parallel", "parallel", "arbitrary")),
        vmem_limit_bytes=32 * 1024 * 1024,  # explicit; worst-case tiles ~10 MiB
    )

    if grid_k == 1:
        grid = (grid_m, grid_n)
        x_spec = pl.BlockSpec((tm, tk), lambda i, j: (i, 0))
        w_spec = pl.BlockSpec((tn, tk), lambda i, j: (j, 0))
        b_spec = pl.BlockSpec((1, tn), lambda i, j: (0, j))
        o_spec = pl.BlockSpec((tm, tn), lambda i, j: (i, j))
        kernel = _kernel_single_bias if use_bias else _kernel_single_nobias
    else:
        grid = (grid_m, grid_n, grid_k)
        x_spec = pl.BlockSpec((tm, tk), lambda i, j, k: (i, k))
        w_spec = pl.BlockSpec((tn, tk), lambda i, j, k: (j, k))
        b_spec = pl.BlockSpec((1, tn), lambda i, j, k: (0, j))
        o_spec = pl.BlockSpec((tm, tn), lambda i, j, k: (i, j))
        kernel = _kernel_multi_bias if use_bias else _kernel_multi_nobias

    in_specs = [x_spec, w_spec]
    operands = [x_p, w_p]
    if use_bias:
        b_p = bias if Fp == F_out else jnp.pad(bias, (0, Fp - F_out))
        in_specs.append(b_spec)
        operands.append(b_p.reshape(1, Fp).astype(jnp.float32))

    out_p = pl.pallas_call(
        kernel,
        out_shape=out_shape,
        grid_spec=pl.GridSpec(grid=grid, in_specs=in_specs, out_specs=o_spec),
        compiler_params=compiler_params,
    )(*operands)

    if Bp != B or Fp != F_out:
        out_p = out_p[:B, :F_out]
    return out_p.astype(x.dtype)


def xavier_uniform(key, shape, dtype=jnp.float32):
    """Matches torch.nn.init.xavier_uniform_ for a 2-D weight [fan_out, fan_in]."""
    fan_out, fan_in = shape
    limit = (6.0 / (fan_in + fan_out)) ** 0.5
    return jax.random.uniform(key, shape, dtype, minval=-limit, maxval=limit)


# TODO(synk): the `params` dict override path (extract_top_level_dict) is host-side
# plumbing; here the (possibly overridden) weights/bias are simply passed as args.
if __name__ == "__main__":
    # MetaLinearLayer(input_shape=(b, c), num_filters, use_bias=True)
    batch, in_features, num_filters = 8, 32, 16

    key = jax.random.PRNGKey(0)
    kx, kw = jax.random.split(key)

    x = jax.random.normal(kx, (batch, in_features), dtype=jnp.float32)
    weights = xavier_uniform(kw, (num_filters, in_features))   # ones -> xavier_uniform_
    bias = jnp.zeros((num_filters,), dtype=jnp.float32)        # torch.zeros(num_filters)

    out = meta_linear_forward(x, weights, bias, use_bias=True)
    jax.block_until_ready(out)

    ref = x @ weights.T + bias
    assert out.shape == (batch, num_filters)
    assert jnp.allclose(out, ref, atol=1e-5, rtol=1e-5)

    # No-bias path.
    out_nb = meta_linear_forward(x, weights, use_bias=False)
    jax.block_until_ready(out_nb)
    assert jnp.allclose(out_nb, x @ weights.T, atol=1e-5, rtol=1e-5)

    # Ragged shape: exercises bounded-padding tile selection (Bp=304, not 512)
    # and the megacore tm-split path; single K step.
    k2, k3, k4 = jax.random.split(jax.random.PRNGKey(1), 3)
    x2 = jax.random.normal(k2, (300, 384), dtype=jnp.float32)
    w2 = xavier_uniform(k3, (200, 384))
    b2 = jax.random.normal(k4, (200,), dtype=jnp.float32)
    out2 = meta_linear_forward(x2, w2, b2, use_bias=True)
    jax.block_until_ready(out2)
    assert jnp.allclose(out2, x2 @ w2.T + b2, atol=1e-4, rtol=1e-4)

    # Multi-K-step path (C > 1024): in-place accumulation into the output tile.
    k5, k6 = jax.random.split(jax.random.PRNGKey(2))
    x3 = jax.random.normal(k5, (16, 1536), dtype=jnp.float32)
    w3 = xavier_uniform(k6, (64, 1536))
    out3 = meta_linear_forward(x3, w3, use_bias=False)
    jax.block_until_ready(out3)
    assert jnp.allclose(out3, x3 @ w3.T, atol=1e-4, rtol=1e-4)

    print("KERNEL_OK")
</pallas_src>

<mosaic_0001>
module attributes {stable_mosaic.version = 11 : i64} {
  func.func @_kernel_single_bias(%arg0: i32, %arg1: i32, %arg2: memref<8x128xf32, #tpu.memory_space<vmem>>, %arg3: memref<128x128xf32, #tpu.memory_space<vmem>>, %arg4: memref<1x128xf32, #tpu.memory_space<vmem>>, %arg5: memref<8x128xf32, #tpu.memory_space<vmem>>) attributes {dimension_semantics = [#tpu.dimension_semantics<parallel>, #tpu.dimension_semantics<parallel>], iteration_bounds = array<i64: 1, 1>, scalar_prefetch = 0 : i64, scratch_operands = 0 : i64, tpu.core_type = #tpu.core_type<tc>, window_params = [{transform_indices = @transform_0, window_bounds = array<i64: 8, 128>}, {transform_indices = @transform_1, window_bounds = array<i64: 128, 128>}, {transform_indices = @transform_2, window_bounds = array<i64: 1, 128>}, {transform_indices = @transform_3, window_bounds = array<i64: 8, 128>}]} {
    %c0 = arith.constant 0 : index
    %c0_0 = arith.constant 0 : index
    %0 = vector.load %arg2[%c0, %c0_0] : memref<8x128xf32, #tpu.memory_space<vmem>>, vector<8x128xf32>
    %c0_1 = arith.constant 0 : index
    %c0_2 = arith.constant 0 : index
    %1 = vector.load %arg3[%c0_1, %c0_2] : memref<128x128xf32, #tpu.memory_space<vmem>>, vector<128x128xf32>
    %cst = arith.constant dense<0.000000e+00> : vector<8x128xf32>
    %2 = tpu.matmul %0, %1, %cst {dimension_numbers = #tpu.dot_dimension_numbers<[1], [1], [0], [0], [0, 0, 1, 0], [], []>} : vector<8x128xf32>, vector<128x128xf32>, vector<8x128xf32> -> vector<8x128xf32>
    %c0_3 = arith.constant 0 : index
    %c0_4 = arith.constant 0 : index
    %3 = vector.load %arg4[%c0_3, %c0_4] : memref<1x128xf32, #tpu.memory_space<vmem>>, vector<1x128xf32>
    %4 = vector.broadcast %3 : vector<1x128xf32> to vector<8x128xf32>
    %5 = arith.addf %2, %4 : vector<8x128xf32>
    %c0_5 = arith.constant 0 : index
    %c0_6 = arith.constant 0 : index
    %6 = vector.load %arg5[%c0_5, %c0_6] : memref<8x128xf32, #tpu.memory_space<vmem>>, vector<8x128xf32>
    tpu.vector_store %arg5[%c0_5, %c0_6], %5 {strides = array<i32>} : memref<8x128xf32, #tpu.memory_space<vmem>>, vector<8x128xf32>,
    return
  }
  func.func @transform_0(%arg0: i32, %arg1: i32) -> (i32, i32) {
    %c0_i32 = arith.constant 0 : i32
    %c0_i32_0 = arith.constant 0 : i32
    return %arg0, %c0_i32 : i32, i32
  }
  func.func @transform_1(%arg0: i32, %arg1: i32) -> (i32, i32) {
    %c0_i32 = arith.constant 0 : i32
    %c0_i32_0 = arith.constant 0 : i32
    return %arg1, %c0_i32 : i32, i32
  }
  func.func @transform_2(%arg0: i32, %arg1: i32) -> (i32, i32) {
    %c0_i32 = arith.constant 0 : i32
    %c0_i32_0 = arith.constant 0 : i32
    return %c0_i32, %arg1 : i32, i32
  }
  func.func @transform_3(%arg0: i32, %arg1: i32) -> (i32, i32) {
    %c0_i32 = arith.constant 0 : i32
    return %arg0, %arg1 : i32, i32
  }
}

</mosaic_0001>

<bundles_post_ra>
// kernel: meta_linear_forward.1
= control target key start
LH: loop header
LB: loop body
LE: loop exit
PB: predicated region body
PF: predicated region fallthrough
CT: control target
= control target key end

     0   :  { %v229_v2 = vmov 0.0|0.0   ;;  %vm230_vm0 = vmmov 0   ;;  %v231_v4 = vmov 0.0   ;;  %s319_s0 = inlined_call_operand.vmem [shape: f32[8,128], index: 0, kind: input, shape index: {}]   ;;  %s320_s1 = inlined_call_operand.vmem [shape: f32[128,128], index: 1, kind: input, shape index: {}]   ;;  %s321_s2 = inlined_call_operand.vmem [shape: f32[1,128], index: 2, kind: input, shape index: {}]   ;;  %s322_s3 = inlined_call_operand.hbm [shape: f32[8,128], index: 3, kind: output, shape index: {}]  }
   0x1   :  { %v16_v0 = vld [vmem:[%s320_s1] sm:$0xff]  ;;  %v17_v1 = vld [vmem:[%s320_s1 + $0x8] sm:$0xff]  ;;  %177 = vmatprep.subr.bf16.mxu0 %v229_v2  ;;  %174 = vmatprep.mubr.msk.f32.mxu0 %vm230_vm0, %v231_v4  ;;  %v18_v5 = vld [vmem:[%s320_s1 + $0x10] sm:$0xff] }
   0x2   :  { %v178_v3 = vpack.c.bf16 %v17_v1, %v16_v0  ;;  %v19_v6 = vld [vmem:[%s320_s1 + $0x18] sm:$0xff] }
   0x4   :  { %179 = vmatpush3.bf16.xpose.msra.mxu0 %v178_v3 }
   0x5   :  { %180 = vmatprep.subr.bf16.mxu0 %v229_v2 }
   0x6   :  { %8 = vsyncpa [#allocation3], 0  ;;  %v181_v7 = vpack.c.bf16 %v19_v6, %v18_v5  ;;  %v20_v8 = vld [vmem:[%s320_s1 + $0x20] sm:$0xff]  ;;  %v21_v9 = vld [vmem:[%s320_s1 + $0x28] sm:$0xff]  ;;  %s232_s21 = smov [#allocation2]  }
   0x7   :  { %v184_v10 = vpack.c.bf16 %v21_v9, %v20_v8  ;;  %v22_v11 = vld [vmem:[%s320_s1 + $0x30] sm:$0xff]  ;;  %v23_v12 = vld [vmem:[%s320_s1 + $0x38] sm:$0xff]  ;;  %v24_v14 = vld [vmem:[%s320_s1 + $0x40] sm:$0xff]  ;;  %s116_s22 = sshll.u32 %s232_s21, 4  ;;  %s117_s22 = int_to_ptr.vmem [resolvable:$true] %s116_s22 }
   0x8   :  { %v187_v13 = vpack.c.bf16 %v23_v12, %v22_v11  ;;  %v25_v15 = vld [vmem:[%s320_s1 + $0x48] sm:$0xff]  ;;  %v26_v17 = vld [vmem:[%s320_s1 + $0x50] sm:$0xff]  ;;  %v27_v18 = vld [vmem:[%s320_s1 + $0x58] sm:$0xff]  ;;  %s205_s23 = scalar_lea.vmem %s117_s22, 128  ;;  %p210_p1 = scmp.lt.s32.totalorder %s117_s22, %s117_s22 }
   0x9   :  { %v190_v16 = vpack.c.bf16 %v25_v15, %v24_v14  ;;  %v193_v19 = vpack.c.bf16 %v27_v18, %v26_v17  ;;  %v28_v20 = vld [vmem:[%s320_s1 + $0x60] sm:$0xff]  ;;  %v29_v21 = vld [vmem:[%s320_s1 + $0x68] sm:$0xff]  ;;  %v30_v23 = vld [vmem:[%s320_s1 + $0x70] sm:$0xff]  ;;  %p206_p0 = scmp.ne.s32.totalorder %s117_s22, %s205_s23  ;;  %p211_p2 = scmp.lt.s32.totalorder %s205_s23, %s205_s23 }
   0xa   :  { %v196_v22 = vpack.c.bf16 %v29_v21, %v28_v20  ;;  %v31_v24 = vld [vmem:[%s320_s1 + $0x78] sm:$0xff]  ;;  %v15_v26 = vld [vmem:[%s319_s0] sm:$0xff] }
   0xb   :  { %v199_v25 = vpack.c.bf16 %v31_v24, %v30_v23  ;;  %v124_v27 = vld [vmem:[%s321_s2] ss:$0 sm:$0xff]  ;;  %p212_p3 = por %p211_p2, %p210_p1 }
   0xc   :  { %182 = vmatpush3.bf16.xpose.msra.mxu0 %v181_v7 }
   0xd   :  { %183 = vmatprep.subr.bf16.mxu0 %v229_v2  ;;  %p213_p4 = pnand %p212_p3, %p206_p0 }
  0x14   :  { %185 = vmatpush3.bf16.xpose.msra.mxu0 %v184_v10 }
  0x15   :  { %186 = vmatprep.subr.bf16.mxu0 %v229_v2 }
  0x1c   :  { %188 = vmatpush3.bf16.xpose.msra.mxu0 %v187_v13 }
  0x1d   :  { %189 = vmatprep.subr.bf16.mxu0 %v229_v2 }
  0x24   :  { %191 = vmatpush3.bf16.xpose.msra.mxu0 %v190_v16 }
  0x25   :  { %192 = vmatprep.subr.bf16.mxu0 %v229_v2 }
  0x2c   :  { %194 = vmatpush3.bf16.xpose.msra.mxu0 %v193_v19 }
  0x2d   :  { %195 = vmatprep.subr.bf16.mxu0 %v229_v2 }
  0x34   :  { %197 = vmatpush3.bf16.xpose.msra.mxu0 %v196_v22 }
  0x35   :  { %198 = vmatprep.subr.bf16.mxu0 %v229_v2 }
  0x3c   :  { %200 = vmatpush3.bf16.xpose.msra.mxu0 %v199_v25 }
  0x43   :  { %175 = vmatmul.mubr.f32.vlgmr.msra.gmra.mrb[0].mxu0 %v15_v26 }
 0x116   :  { %v105_v28 = vpop.f32.mrb[0].mxu0 }
 0x117   :  { %v106_v29 = vadd.f32 %v124_v27, %v105_v28  ;;  %v176_v30 = vpop.f32.mrb[1].mxu0 }
 0x119   :  { %109 = vst [vmem:[#allocation2] sm:$0xff] %v106_v29 }
 0x11a   :  { %216 = shalt.err (!%p213_p4)
}
 0x11b   :  { %s217_s24 = scalar_lea.hbm %s322_s3, 128 }
 0x11c   :  { %p218_p5 = scmp.ne.s32.totalorder %s322_s3, %s217_s24  ;;  %p221_p6 = scmp.lt.u32.totalorder %s217_s24, %s322_s3 }
 0x11e   :  { %p223_p7 = pnand %p221_p6, %p218_p5 }
 0x120   :  { %226 = shalt.err (!%p223_p7)
}
 0x121   :  { %119 = dma.vmem_to_hbm [thread:$0]  %s117_s22, 128, %s322_s3, [#allocation3]  }
 0x122   :  { %227 = dma.done.wait [#allocation3], 128  }
 0x123   :  { %228 = vsyncadd [#allocation3], 4294967168 }
 0x124   :  { %123 = vsyncpa [#allocation3], 1 }

</bundles_post_ra>
